<compile_context>
chip_gen: v7x
topology: tpu7x:2x2x1
jax: 0.10.0
libtpu: 0.0.40
codegen_flags: <defaults>
</compile_context>

<pallas_src>
import jax
import jax.numpy as jnp
from jax.experimental import pallas as pl
from jax.experimental.pallas import tpu as pltpu

EPS = 1e-5

_TARGET_BLOCK_BYTES = 8 * 1024 * 1024   # ~8 MiB x-blocks (in+out dbl-buffered ~= 32 MiB)
_VMEM_LIMIT_BYTES = 48 * 1024 * 1024    # headroom under v7x's 64 MiB physical VMEM
_MAX_LANE_BLOCK = 4096                  # lanes per block (multiple of 128)


def _round_up(x, m):
    return ((x + m - 1) // m) * m


def _sublane_align(dtype):
    # Sub-32-bit dtypes pack along sublanes: 8 rows for f32, 16 for bf16, 32 for int8.
    itemsize = jnp.dtype(dtype).itemsize
    return max(8, 8 * (4 // max(itemsize, 1)))


def _row_cap(lane_block, itemsize, sub):
    cap = (_TARGET_BLOCK_BYTES // (lane_block * itemsize)) // sub * sub
    return max(sub, cap)


def _compiler_params():
    return pltpu.CompilerParams(
        dimension_semantics=("parallel", "parallel"),
        vmem_limit_bytes=_VMEM_LIMIT_BYTES)


def _fba_kernel(x_ref, scale_ref, shift_ref, o_ref):
    # Single VPU FMA sweep: upcast tile to f32, FMA, downcast only on the store.
    x = x_ref[...].astype(jnp.float32)
    o_ref[...] = (x * scale_ref[...] + shift_ref[...]).astype(o_ref.dtype)


def frozen_batch_norm(x_nchw, weight, bias, running_mean, running_var, eps=EPS):
    """FrozenBatchNorm2d forward.  x_nchw: (N, C, H, W). Returns (N, C, H, W)."""
    N, C, H, W = x_nchw.shape
    HW = H * W
    dtype = x_nchw.dtype
    itemsize = jnp.dtype(dtype).itemsize
    sub = _sublane_align(dtype)

    # Fold the frozen statistics into a per-channel affine (kept in f32).
    scale = weight.astype(jnp.float32) * jax.lax.rsqrt(
        running_var.astype(jnp.float32) + eps)
    shift = bias.astype(jnp.float32) - running_mean.astype(jnp.float32) * scale

    # ---- lane-dense path for small / non-128-divisible spatial extents -----
    lane_dense_lw = None
    if HW % 128 != 0 and HW <= 2048:
        for cand in range(1024, 0, -128):
            if (C * HW) % cand == 0:
                lane_dense_lw = cand
                break

    if lane_dense_lw is not None:
        lw = lane_dense_lw
        rows_per_image = (C * HW) // lw
        x3 = x_nchw.reshape(N, rows_per_image, lw)
        # Broadcast the affine to the flattened (C*HW) layout (tiny: C*HW f32).
        scale3 = jnp.broadcast_to(scale[:, None], (C, HW)).reshape(rows_per_image, lw)
        shift3 = jnp.broadcast_to(shift[:, None], (C, HW)).reshape(rows_per_image, lw)

        row_block = min(_round_up(rows_per_image, sub), _row_cap(lw, itemsize, sub))
        # N innermost so the scale/shift blocks are not re-fetched per image.
        grid = (pl.cdiv(rows_per_image, row_block), N)

        out = pl.pallas_call(
            _fba_kernel,
            out_shape=jax.ShapeDtypeStruct((N, rows_per_image, lw), dtype),
            grid=grid,
            in_specs=[
                pl.BlockSpec((pl.Squeezed(), row_block, lw),
                             lambda r, n: (n, r, 0)),
                pl.BlockSpec((row_block, lw), lambda r, n: (r, 0)),
                pl.BlockSpec((row_block, lw), lambda r, n: (r, 0)),
            ],
            out_specs=pl.BlockSpec((pl.Squeezed(), row_block, lw),
                                   lambda r, n: (n, r, 0)),
            compiler_params=_compiler_params(),
        )(x3, scale3, shift3)
        return out.reshape(N, C, H, W)

    # ---- general streaming path: rows = N*C (sublanes), lanes = H*W --------
    rows = N * C
    x2 = x_nchw.reshape(rows, HW)
    scale2 = jnp.tile(scale, N).reshape(rows, 1)   # N*C f32 -- negligible bytes
    shift2 = jnp.tile(shift, N).reshape(rows, 1)

    lane_block = min(_MAX_LANE_BLOCK, _round_up(HW, 128))
    row_block = min(_round_up(rows, sub), _row_cap(lane_block, itemsize, sub))
    grid = (pl.cdiv(rows, row_block), pl.cdiv(HW, lane_block))

    out = pl.pallas_call(
        _fba_kernel,
        out_shape=jax.ShapeDtypeStruct((rows, HW), dtype),
        grid=grid,
        in_specs=[
            pl.BlockSpec((row_block, lane_block), lambda r, c: (r, c)),
            pl.BlockSpec((row_block, 1), lambda r, c: (r, 0)),
            pl.BlockSpec((row_block, 1), lambda r, c: (r, 0)),
        ],
        out_specs=pl.BlockSpec((row_block, lane_block), lambda r, c: (r, c)),
        compiler_params=_compiler_params(),
    )(x2, scale2, shift2)
    return out.reshape(N, C, H, W)


def _reference(x_f32, weight, bias, running_mean, running_var, eps=EPS):
    # Pure-JAX mirror of F.batch_norm(..., training=False), in f32.
    scale = weight * jax.lax.rsqrt(running_var + eps)
    shift = bias - running_mean * scale
    return x_f32 * scale[None, :, None, None] + shift[None, :, None, None]


if __name__ == "__main__":
    key = jax.random.PRNGKey(0)

    def make_params(kp, C):
        k = jax.random.split(kp, 4)
        weight = 1.0 + 0.1 * jax.random.normal(k[0], (C,), jnp.float32)
        bias = 0.1 * jax.random.normal(k[1], (C,), jnp.float32)
        running_mean = 0.05 * jax.random.normal(k[2], (C,), jnp.float32)
        running_var = 1.0 - EPS + 0.1 * jax.random.uniform(k[3], (C,), jnp.float32)
        return weight, bias, running_mean, running_var

    cases = [
        ((2, 4, 16, 16), jnp.float32, 1e-4),   # lane-aligned HW -> streaming path
        ((2, 128, 7, 7), jnp.float32, 1e-4),   # small unaligned HW -> lane-dense path
        ((1, 6, 5, 5), jnp.float32, 1e-4),     # ragged rows & lanes -> masked tails
        ((2, 4, 16, 16), jnp.bfloat16, 5e-2),  # low-precision activations, f32 math
    ]

    for idx, (shape, dtype, tol) in enumerate(cases):
        kc = jax.random.fold_in(key, idx)
        kx, kp = jax.random.split(kc)
        N, C, H, W = shape
        x = jax.random.normal(kx, shape, jnp.float32).astype(dtype)
        weight, bias, running_mean, running_var = make_params(kp, C)

        out = frozen_batch_norm(x, weight, bias, running_mean, running_var)
        out = jax.block_until_ready(out)

        ref = _reference(x.astype(jnp.float32), weight, bias,
                         running_mean, running_var)
        assert out.shape == shape
        assert out.dtype == dtype
        err = float(jnp.max(jnp.abs(out.astype(jnp.float32) - ref)))
        assert err < tol, (shape, str(dtype), err)

    print("KERNEL_OK")
</pallas_src>

<mosaic_0001>
module attributes {stable_mosaic.version = 11 : i64} {
  func.func @_fba_kernel(%arg0: i32, %arg1: i32, %arg2: memref<8x256xf32, #tpu.memory_space<vmem>>, %arg3: memref<8x1xf32, #tpu.memory_space<vmem>>, %arg4: memref<8x1xf32, #tpu.memory_space<vmem>>, %arg5: memref<8x256xf32, #tpu.memory_space<vmem>>) attributes {dimension_semantics = [#tpu.dimension_semantics<parallel>, #tpu.dimension_semantics<parallel>], iteration_bounds = array<i64: 1, 1>, scalar_prefetch = 0 : i64, scratch_operands = 0 : i64, tpu.core_type = #tpu.core_type<tc>, window_params = [{transform_indices = @transform_0, window_bounds = array<i64: 8, 256>}, {transform_indices = @transform_1, window_bounds = array<i64: 8, 1>}, {transform_indices = @transform_2, window_bounds = array<i64: 8, 1>}, {transform_indices = @transform_3, window_bounds = array<i64: 8, 256>}]} {
    %c0 = arith.constant 0 : index
    %c0_0 = arith.constant 0 : index
    %0 = vector.load %arg2[%c0, %c0_0] : memref<8x256xf32, #tpu.memory_space<vmem>>, vector<8x256xf32>
    %c0_1 = arith.constant 0 : index
    %c0_2 = arith.constant 0 : index
    %1 = vector.load %arg3[%c0_1, %c0_2] : memref<8x1xf32, #tpu.memory_space<vmem>>, vector<8x1xf32>
    %2 = vector.broadcast %1 : vector<8x1xf32> to vector<8x256xf32>
    %3 = arith.mulf %0, %2 : vector<8x256xf32>
    %c0_3 = arith.constant 0 : index
    %c0_4 = arith.constant 0 : index
    %4 = vector.load %arg4[%c0_3, %c0_4] : memref<8x1xf32, #tpu.memory_space<vmem>>, vector<8x1xf32>
    %5 = vector.broadcast %4 : vector<8x1xf32> to vector<8x256xf32>
    %6 = arith.addf %3, %5 : vector<8x256xf32>
    %c0_5 = arith.constant 0 : index
    %c0_6 = arith.constant 0 : index
    %7 = vector.load %arg5[%c0_5, %c0_6] : memref<8x256xf32, #tpu.memory_space<vmem>>, vector<8x256xf32>
    tpu.vector_store %arg5[%c0_5, %c0_6], %6 {strides = array<i32>} : memref<8x256xf32, #tpu.memory_space<vmem>>, vector<8x256xf32>,
    return
  }
  func.func @transform_0(%arg0: i32, %arg1: i32) -> (i32, i32) {
    %c0_i32 = arith.constant 0 : i32
    return %arg0, %arg1 : i32, i32
  }
  func.func @transform_1(%arg0: i32, %arg1: i32) -> (i32, i32) {
    %c0_i32 = arith.constant 0 : i32
    %c0_i32_0 = arith.constant 0 : i32
    return %arg0, %c0_i32 : i32, i32
  }
  func.func @transform_2(%arg0: i32, %arg1: i32) -> (i32, i32) {
    %c0_i32 = arith.constant 0 : i32
    %c0_i32_0 = arith.constant 0 : i32
    return %arg0, %c0_i32 : i32, i32
  }
  func.func @transform_3(%arg0: i32, %arg1: i32) -> (i32, i32) {
    %c0_i32 = arith.constant 0 : i32
    return %arg0, %arg1 : i32, i32
  }
}

</mosaic_0001>

<bundles_post_ra>
// kernel: tpu_custom_call.1
= control target key start
LH: loop header
LB: loop body
LE: loop exit
PB: predicated region body
PF: predicated region fallthrough
CT: control target
= control target key end

     0   :  { %s122_s0 = inlined_call_operand.vmem [shape: f32[8,256], index: 0, kind: input, shape index: {}]   ;;  %s123_s1 = inlined_call_operand.vmem [shape: f32[8,1], index: 1, kind: input, shape index: {}]   ;;  %s124_s2 = inlined_call_operand.vmem [shape: f32[8,1], index: 2, kind: input, shape index: {}]   ;;  %s125_s3 = inlined_call_operand.hbm [shape: f32[8,256], index: 3, kind: output, shape index: {}]  }
   0x1   :  { %v17_v0 = vld [vmem:[%s123_s1] sm:$0xff] }
   0x2   :  { %8 = vsyncpa [#allocation3], 0  ;;  %v76_v1 = vmov 0   ;;  %v25_v2 = vld [vmem:[%s124_s2] sm:$0xff]  ;;  %v16_v5 = vld [vmem:[%s122_s0 + $0x8] sm:$0xff]  ;;  %s77_s20 = smov [#allocation2]  }
   0x3   :  { %51 = vset.pattern.permute.xlu0 %v76_v1  ;;  %v15_v4 = vld [vmem:[%s122_s0] sm:$0xff]  ;;  %s41_s1 = sshll.u32 %s77_s20, 4  ;;  %s42_s1 = int_to_ptr.vmem [resolvable:$true] %s41_s1 }
   0x4   :  { %20 = vperm.xlu0 %51, %v17_v0   ;;  %s52_s2 = scalar_lea.vmem %s42_s1, 256  ;;  %p57_p1 = scmp.lt.s32.totalorder %s42_s1, %s42_s1 }
   0x5   :  { %p53_p0 = scmp.ne.s32.totalorder %s42_s1, %s52_s2  ;;  %p58_p2 = scmp.lt.s32.totalorder %s52_s2, %s52_s2 }
   0x7   :  { %p59_p3 = por %p58_p2, %p57_p1 }
   0x8   :  { %28 = vperm.xlu0 %51, %v25_v2  }
   0x9   :  { %p60_p4 = pnand %p59_p3, %p53_p0 }
  0x83   :  { %v21_v3 = vpop.permute.xlu0 %20 }
  0x84   :  { %v23_v6 = vmul.f32 %v21_v3, %v15_v4  ;;  %v24_v7 = vmul.f32 %v21_v3, %v16_v5 }
  0x87   :  { %v29_v8 = vpop.permute.xlu0 %28 }
  0x88   :  { %v31_v9 = vadd.f32 %v29_v8, %v23_v6  ;;  %v32_v10 = vadd.f32 %v29_v8, %v24_v7 }
  0x8a   :  { %33 = vst [vmem:[#allocation2] sm:$0xff] %v31_v9  ;;  %34 = vst [vmem:[#allocation2 + $0x8] sm:$0xff] %v32_v10 }
  0x8b   :  { %63 = shalt.err (!%p60_p4)
}
  0x8c   :  { %s64_s0 = scalar_lea.hbm %s125_s3, 256 }
  0x8d   :  { %p65_p5 = scmp.ne.s32.totalorder %s125_s3, %s64_s0  ;;  %p68_p6 = scmp.lt.u32.totalorder %s64_s0, %s125_s3 }
  0x8f   :  { %p70_p7 = pnand %p68_p6, %p65_p5 }
  0x91   :  { %73 = shalt.err (!%p70_p7)
}
  0x92   :  { %44 = dma.vmem_to_hbm [thread:$0]  %s42_s1, 256, %s125_s3, [#allocation3]  }
  0x93   :  { %74 = dma.done.wait [#allocation3], 256  }
  0x94   :  { %75 = vsyncadd [#allocation3], 4294967040 }
  0x95   :  { %48 = vsyncpa [#allocation3], 1 }

</bundles_post_ra>
